<compile_context>
chip_gen: v7x
topology: tpu7x:2x2x1
jax: 0.10.0
libtpu: 0.0.40
codegen_flags: <defaults>
</compile_context>

<pallas_src>
import functools

import jax
import jax.numpy as jnp
from jax import lax
from jax.experimental import pallas as pl
from jax.experimental.pallas import tpu as pltpu

EPS = 1e-5            # nn.BatchNorm1d default eps
NEG_SLOPE = 0.01      # F.leaky_relu default negative_slope
DROPOUT_RATE = 0.2
_LANES = 128


def _round_up(n, m):
    return (n + m - 1) // m * m


def _leaky_relu(x):
    return jnp.where(x > 0, x, NEG_SLOPE * x)


def _bn_fold_lanes(h, gamma, beta, inv_b):
    """Training-mode BatchNorm over the lane (batch) axis, folded to scale/shift.

    Zero-padded batch columns contribute exactly 0 to both sums, so dividing by
    the true batch size gives exact statistics."""
    s = jnp.sum(h, axis=1, keepdims=True) * inv_b          # mean
    ss = jnp.sum(h * h, axis=1, keepdims=True) * inv_b     # E[h^2]
    var = ss - s * s                                        # biased variance
    scale = gamma * lax.rsqrt(var + EPS)
    return h * scale + (beta - s * scale)


# ----------------------------------------------------------------------------
# Fused single-block kernels (whole problem resident in VMEM).
# ----------------------------------------------------------------------------
def _fused_bn_kernel(inv_b, x_ref, w1_ref, g1_ref, be1_ref,
                     w2_ref, g2_ref, be2_ref, m_ref, o_ref):
    xT = x_ref[...]                                                    # (D, Bp)
    # fc1 (bias dropped: exactly cancelled by the BN mean subtraction)
    h = jnp.dot(w1_ref[...], xT, preferred_element_type=jnp.float32)  # (H, Bp)
    h = _bn_fold_lanes(h, g1_ref[...], be1_ref[...], inv_b)
    h = _leaky_relu(h) * m_ref[...].astype(jnp.float32)               # dropout
    # fc2 (bias dropped again)
    y = jnp.dot(w2_ref[...], h, preferred_element_type=jnp.float32)   # (D, Bp)
    y = _bn_fold_lanes(y, g2_ref[...], be2_ref[...], inv_b)
    o_ref[...] = _leaky_relu(y + xT).astype(o_ref.dtype)


def _fused_nobn_kernel(x_ref, w1_ref, b1_ref, w2_ref, b2_ref, m_ref, o_ref):
    # batch == 1 path: BatchNorm skipped, linear biases kept.
    xT = x_ref[...]
    h = jnp.dot(w1_ref[...], xT, preferred_element_type=jnp.float32) + b1_ref[...]
    h = _leaky_relu(h) * m_ref[...].astype(jnp.float32)
    y = jnp.dot(w2_ref[...], h, preferred_element_type=jnp.float32) + b2_ref[...]
    o_ref[...] = _leaky_relu(y + xT).astype(o_ref.dtype)


# ----------------------------------------------------------------------------
# Tiled 3-pass kernels (batch gridded; BN stats stay global over the batch).
# ----------------------------------------------------------------------------
def _stats1_kernel(x_ref, w1_ref, s_ref, ss_ref):
    @pl.when(pl.program_id(0) == 0)
    def _init():
        s_ref[...] = jnp.zeros_like(s_ref)
        ss_ref[...] = jnp.zeros_like(ss_ref)

    h = jnp.dot(w1_ref[...], x_ref[...], preferred_element_type=jnp.float32)
    s_ref[...] += jnp.sum(h, axis=1, keepdims=True)
    ss_ref[...] += jnp.sum(h * h, axis=1, keepdims=True)


def _mid_kernel(x_ref, w1_ref, sc1_ref, sh1_ref, m_ref, w2_ref,
                ypre_ref, s2_ref, ss2_ref):
    @pl.when(pl.program_id(0) == 0)
    def _init():
        s2_ref[...] = jnp.zeros_like(s2_ref)
        ss2_ref[...] = jnp.zeros_like(ss2_ref)

    h = jnp.dot(w1_ref[...], x_ref[...], preferred_element_type=jnp.float32)
    h = h * sc1_ref[...] + sh1_ref[...]                    # folded BN1
    h = _leaky_relu(h) * m_ref[...].astype(jnp.float32)    # dropout
    y = jnp.dot(w2_ref[...], h, preferred_element_type=jnp.float32)
    ypre_ref[...] = y
    s2_ref[...] += jnp.sum(y, axis=1, keepdims=True)
    ss2_ref[...] += jnp.sum(y * y, axis=1, keepdims=True)


def _final_kernel(ypre_ref, x_ref, sc2_ref, sh2_ref, o_ref):
    y = ypre_ref[...] * sc2_ref[...] + sh2_ref[...] + x_ref[...]
    o_ref[...] = _leaky_relu(y).astype(o_ref.dtype)


def _fold_bn(s, ss, gamma_col, beta_col, inv_b):
    mean = s * inv_b
    var = ss * inv_b - mean * mean
    scale = gamma_col * lax.rsqrt(var + EPS)
    shift = beta_col - mean * scale
    return scale, shift


# ----------------------------------------------------------------------------
# Wrapper
# ----------------------------------------------------------------------------
def residual_block(x, params, dropout_mask, *, tile_b=512, fused_max_b=1024):
    """Forward pass of ResidualBlock.

    x:            (B, input_dim) float32
    dropout_mask: (B, hidden_dim) pre-scaled inverted-dropout keep mask ({0, 1/(1-p)})
    params:       PyTorch-layout tensors
                  (w1 (H,D), b1 (H,), g1 (H,), be1 (H,),
                   w2 (D,H), b2 (D,), g2 (D,), be2 (D,))
    """
    w1, b1, g1, be1, w2, b2, g2, be2 = params
    B, D = x.shape
    H = w1.shape[0]
    f32 = jnp.float32
    w1f = w1.astype(f32)
    w2f = w2.astype(f32)
    col = lambda v: jnp.asarray(v, f32).reshape(-1, 1)
    apply_bn = B > 1                     # static, mirrors `if out.size(0) > 1`

    fused = (B == 1) or (B <= fused_max_b)
    if fused:
        Bp = _round_up(B, _LANES)
        TB = Bp
    else:
        assert tile_b % _LANES == 0, "tile_b must be a multiple of 128 lanes"
        TB = tile_b
        Bp = _round_up(B, TB)
    nb = Bp // TB

    # Lane-dense transposed layout, zero-padded along the batch (lane) axis.
    xT = x.astype(f32).T                                  # (D, B)
    mT = dropout_mask.astype(jnp.bfloat16).T              # (H, B), bf16-exact
    pad = Bp - B
    if pad:
        xT = jnp.pad(xT, ((0, 0), (0, pad)))
        mT = jnp.pad(mT, ((0, 0), (0, pad)))

    if fused:
        vmem = pl.BlockSpec(memory_space=pltpu.MemorySpace.VMEM)
        if apply_bn:
            kernel = functools.partial(_fused_bn_kernel, 1.0 / B)
            args = (xT, w1f, col(g1), col(be1), w2f, col(g2), col(be2), mT)
        else:
            kernel = _fused_nobn_kernel
            args = (xT, w1f, col(b1), w2f, col(b2), mT)
        outT = pl.pallas_call(
            kernel,
            out_shape=jax.ShapeDtypeStruct((D, Bp), f32),
            in_specs=[vmem] * len(args),
            out_specs=vmem,
        )(*args)
        return outT[:, :B].T.astype(x.dtype)

    # ------------------ tiled 3-pass path (B > fused_max_b, BN on) ----------
    inv_b = 1.0 / B
    cparams_acc = pltpu.CompilerParams(
        dimension_semantics=("arbitrary",), vmem_limit_bytes=32 * 1024 * 1024)
    cparams_par = pltpu.CompilerParams(
        dimension_semantics=("parallel",), vmem_limit_bytes=32 * 1024 * 1024)

    # Pass A: per-feature sum / sum-of-squares of fc1(x) over the full batch.
    s1, ss1 = pl.pallas_call(
        _stats1_kernel,
        grid=(nb,),
        in_specs=[pl.BlockSpec((D, TB), lambda i: (0, i)),
                  pl.BlockSpec((H, D), lambda i: (0, 0))],
        out_specs=(pl.BlockSpec((H, 1), lambda i: (0, 0)),
                   pl.BlockSpec((H, 1), lambda i: (0, 0))),
        out_shape=(jax.ShapeDtypeStruct((H, 1), f32),
                   jax.ShapeDtypeStruct((H, 1), f32)),
        compiler_params=cparams_acc,
        cost_estimate=pl.CostEstimate(
            flops=2 * D * H * Bp + 3 * H * Bp,
            transcendentals=0,
            bytes_accessed=4 * (D * Bp + H * D + 2 * H)),
    )(xT, w1f)
    scale1, shift1 = _fold_bn(s1, ss1, col(g1), col(be1), inv_b)

    # Pass B: BN1 -> leaky_relu -> dropout -> fc2 ; accumulate BN2 statistics.
    ypre, s2, ss2 = pl.pallas_call(
        _mid_kernel,
        grid=(nb,),
        in_specs=[pl.BlockSpec((D, TB), lambda i: (0, i)),   # x^T tile
                  pl.BlockSpec((H, D), lambda i: (0, 0)),    # w1 (resident)
                  pl.BlockSpec((H, 1), lambda i: (0, 0)),    # BN1 scale
                  pl.BlockSpec((H, 1), lambda i: (0, 0)),    # BN1 shift
                  pl.BlockSpec((H, TB), lambda i: (0, i)),   # dropout mask tile
                  pl.BlockSpec((D, H), lambda i: (0, 0))],   # w2 (resident)
        out_specs=(pl.BlockSpec((D, TB), lambda i: (0, i)),
                   pl.BlockSpec((D, 1), lambda i: (0, 0)),
                   pl.BlockSpec((D, 1), lambda i: (0, 0))),
        out_shape=(jax.ShapeDtypeStruct((D, Bp), f32),
                   jax.ShapeDtypeStruct((D, 1), f32),
                   jax.ShapeDtypeStruct((D, 1), f32)),
        compiler_params=cparams_acc,
        cost_estimate=pl.CostEstimate(
            flops=4 * D * H * Bp + 8 * H * Bp + 3 * D * Bp,
            transcendentals=0,
            bytes_accessed=8 * D * Bp + 2 * H * Bp + 8 * H * D),
    )(xT, w1f, scale1, shift1, mT, w2f)
    scale2, shift2 = _fold_bn(s2, ss2, col(g2), col(be2), inv_b)

    # Pass C: BN2 -> residual add -> leaky_relu (pure elementwise, lane-dense).
    outT = pl.pallas_call(
        _final_kernel,
        grid=(nb,),
        in_specs=[pl.BlockSpec((D, TB), lambda i: (0, i)),
                  pl.BlockSpec((D, TB), lambda i: (0, i)),
                  pl.BlockSpec((D, 1), lambda i: (0, 0)),
                  pl.BlockSpec((D, 1), lambda i: (0, 0))],
        out_specs=pl.BlockSpec((D, TB), lambda i: (0, i)),
        out_shape=jax.ShapeDtypeStruct((D, Bp), f32),
        compiler_params=cparams_par,
        cost_estimate=pl.CostEstimate(
            flops=4 * D * Bp,
            transcendentals=0,
            bytes_accessed=12 * D * Bp),
    )(ypre, xT, scale2, shift2)
    return outT[:, :B].T.astype(x.dtype)


# ----------------------------------------------------------------------------
# Plain-JAX reference (PyTorch-equivalent math) and param init.
# ----------------------------------------------------------------------------
def residual_block_reference(x, params, dropout_mask):
    w1, b1, g1, be1, w2, b2, g2, be2 = params

    def bn(v, gamma, beta):
        mean = jnp.mean(v, axis=0, keepdims=True)
        var = jnp.mean((v - mean) ** 2, axis=0, keepdims=True)   # biased
        return gamma * (v - mean) * lax.rsqrt(var + EPS) + beta

    apply_bn = x.shape[0] > 1
    h = x @ w1.T + b1
    if apply_bn:
        h = bn(h, g1, be1)
    h = _leaky_relu(h)
    h = h * dropout_mask
    y = h @ w2.T + b2
    if apply_bn:
        y = bn(y, g2, be2)
    y = y + x
    return _leaky_relu(y)


def init_params(key, input_dim, hidden_dim):
    k1, k2, k3, k4, k5, k6, k7, k8 = jax.random.split(key, 8)
    lim1 = 1.0 / (input_dim ** 0.5)
    lim2 = 1.0 / (hidden_dim ** 0.5)
    # PyTorch-native layouts: fc1.weight (H, D), fc2.weight (D, H)
    w1 = jax.random.uniform(k1, (hidden_dim, input_dim), jnp.float32, -lim1, lim1)
    b1 = jax.random.uniform(k2, (hidden_dim,), jnp.float32, -lim1, lim1)
    w2 = jax.random.uniform(k3, (input_dim, hidden_dim), jnp.float32, -lim2, lim2)
    b2 = jax.random.uniform(k4, (input_dim,), jnp.float32, -lim2, lim2)
    # BatchNorm affine params (PyTorch default is weight=1 / bias=0; perturbed
    # slightly here so the numerical check exercises the affine path).
    g1 = 1.0 + 0.1 * jax.random.normal(k5, (hidden_dim,), jnp.float32)
    be1 = 0.1 * jax.random.normal(k6, (hidden_dim,), jnp.float32)
    g2 = 1.0 + 0.1 * jax.random.normal(k7, (input_dim,), jnp.float32)
    be2 = 0.1 * jax.random.normal(k8, (input_dim,), jnp.float32)
    return (w1, b1, g1, be1, w2, b2, g2, be2)


if __name__ == "__main__":
    input_dim, hidden_dim = 16, 32
    root = jax.random.PRNGKey(0)
    kparam, kdata = jax.random.split(root)
    params = init_params(kparam, input_dim, hidden_dim)

    # Cases: tiled 3-pass path (ragged last tile), fused single-block with BN,
    # and batch == 1 (BN statically skipped, biases active).
    cases = [
        (200, dict(tile_b=128, fused_max_b=0)),
        (8, {}),
        (1, {}),
    ]
    for idx, (batch, kw) in enumerate(cases):
        kx, kd = jax.random.split(jax.random.fold_in(kdata, idx))
        x = jax.random.normal(kx, (batch, input_dim), jnp.float32)
        keep = jax.random.bernoulli(kd, 1.0 - DROPOUT_RATE, (batch, hidden_dim))
        # TODO(synk): PyTorch's exact Dropout RNG stream cannot be reproduced;
        # an equivalent inverted-dropout keep mask is drawn with jax.random.
        mask = keep.astype(jnp.float32) / (1.0 - DROPOUT_RATE)

        out = jax.block_until_ready(residual_block(x, params, mask, **kw))
        ref = residual_block_reference(x, params, mask)
        assert out.shape == x.shape and out.dtype == x.dtype
        assert jnp.allclose(out, ref, rtol=1e-4, atol=5e-5), (
            f"Pallas output mismatch vs reference (batch={batch})")
    print("KERNEL_OK")
</pallas_src>

<mosaic_0001>
module attributes {stable_mosaic.version = 11 : i64} {
  func.func @_stats1_kernel(%arg0: i32, %arg1: memref<16x128xf32, #tpu.memory_space<vmem>>, %arg2: memref<32x16xf32, #tpu.memory_space<vmem>>, %arg3: memref<32x1xf32, #tpu.memory_space<vmem>>, %arg4: memref<32x1xf32, #tpu.memory_space<vmem>>) attributes {dimension_semantics = [#tpu.dimension_semantics<arbitrary>], iteration_bounds = array<i64: 2>, scalar_prefetch = 0 : i64, scratch_operands = 0 : i64, tpu.core_type = #tpu.core_type<tc>, window_params = [{transform_indices = @transform_0, window_bounds = array<i64: 16, 128>}, {pipeline_mode = #tpu.pipeline_mode<synchronous>, transform_indices = @transform_1, window_bounds = array<i64: 32, 16>}, {pipeline_mode = #tpu.pipeline_mode<synchronous>, transform_indices = @transform_2, window_bounds = array<i64: 32, 1>}, {pipeline_mode = #tpu.pipeline_mode<synchronous>, transform_indices = @transform_3, window_bounds = array<i64: 32, 1>}]} {
    %c0_i32 = arith.constant 0 : i32
    %0 = arith.cmpi eq, %arg0, %c0_i32 : i32
    %1 = arith.extui %0 : i1 to i32
    %c0_i32_0 = arith.constant 0 : i32
    %2 = arith.cmpi ne, %1, %c0_i32_0 : i32
    scf.if %2 {
      %cst_14 = arith.constant 0.000000e+00 : f32
      %17 = vector.broadcast %cst_14 : f32 to vector<32x1xf32>
      %c0_15 = arith.constant 0 : index
      %c0_16 = arith.constant 0 : index
      %18 = vector.load %arg3[%c0_15, %c0_16] : memref<32x1xf32, #tpu.memory_space<vmem>>, vector<32x1xf32>
      tpu.vector_store %arg3[%c0_15, %c0_16], %17 {strides = array<i32>} : memref<32x1xf32, #tpu.memory_space<vmem>>, vector<32x1xf32>,
      %cst_17 = arith.constant 0.000000e+00 : f32
      %19 = vector.broadcast %cst_17 : f32 to vector<32x1xf32>
      %c0_18 = arith.constant 0 : index
      %c0_19 = arith.constant 0 : index
      %20 = vector.load %arg4[%c0_18, %c0_19] : memref<32x1xf32, #tpu.memory_space<vmem>>, vector<32x1xf32>
      tpu.vector_store %arg4[%c0_18, %c0_19], %19 {strides = array<i32>} : memref<32x1xf32, #tpu.memory_space<vmem>>, vector<32x1xf32>,
    } else {
    }
    %c0 = arith.constant 0 : index
    %c0_1 = arith.constant 0 : index
    %3 = vector.load %arg2[%c0, %c0_1] : memref<32x16xf32, #tpu.memory_space<vmem>>, vector<32x16xf32>
    %c0_2 = arith.constant 0 : index
    %c0_3 = arith.constant 0 : index
    %4 = vector.load %arg1[%c0_2, %c0_3] : memref<16x128xf32, #tpu.memory_space<vmem>>, vector<16x128xf32>
    %cst = arith.constant dense<0.000000e+00> : vector<32x128xf32>
    %5 = tpu.matmul %3, %4, %cst {dimension_numbers = #tpu.dot_dimension_numbers<[1], [0], [0], [1], [0, 0, 1, 1], [], []>} : vector<32x16xf32>, vector<16x128xf32>, vector<32x128xf32> -> vector<32x128xf32>
    %c0_4 = arith.constant 0 : index
    %c0_5 = arith.constant 0 : index
    %6 = vector.load %arg3[%c0_4, %c0_5] : memref<32x1xf32, #tpu.memory_space<vmem>>, vector<32x1xf32>
    %cst_6 = arith.constant dense<0.000000e+00> : vector<32xf32>
    %7 = vector.multi_reduction <add>, %5, %cst_6 [1] : vector<32x128xf32> to vector<32xf32>
    %8 = vector.shape_cast %7 : vector<32xf32> to vector<32x1xf32>
    %9 = arith.addf %6, %8 : vector<32x1xf32>
    %c0_7 = arith.constant 0 : index
    %c0_8 = arith.constant 0 : index
    %10 = vector.load %arg3[%c0_7, %c0_8] : memref<32x1xf32, #tpu.memory_space<vmem>>, vector<32x1xf32>
    tpu.vector_store %arg3[%c0_7, %c0_8], %9 {strides = array<i32>} : memref<32x1xf32, #tpu.memory_space<vmem>>, vector<32x1xf32>,
    %c0_9 = arith.constant 0 : index
    %c0_10 = arith.constant 0 : index
    %11 = vector.load %arg4[%c0_9, %c0_10] : memref<32x1xf32, #tpu.memory_space<vmem>>, vector<32x1xf32>
    %12 = arith.mulf %5, %5 : vector<32x128xf32>
    %cst_11 = arith.constant dense<0.000000e+00> : vector<32xf32>
    %13 = vector.multi_reduction <add>, %12, %cst_11 [1] : vector<32x128xf32> to vector<32xf32>
    %14 = vector.shape_cast %13 : vector<32xf32> to vector<32x1xf32>
    %15 = arith.addf %11, %14 : vector<32x1xf32>
    %c0_12 = arith.constant 0 : index
    %c0_13 = arith.constant 0 : index
    %16 = vector.load %arg4[%c0_12, %c0_13] : memref<32x1xf32, #tpu.memory_space<vmem>>, vector<32x1xf32>
    tpu.vector_store %arg4[%c0_12, %c0_13], %15 {strides = array<i32>} : memref<32x1xf32, #tpu.memory_space<vmem>>, vector<32x1xf32>,
    return
  }
  func.func @transform_0(%arg0: i32) -> (i32, i32) {
    %c0_i32 = arith.constant 0 : i32
    %c0_i32_0 = arith.constant 0 : i32
    return %c0_i32, %arg0 : i32, i32
  }
  func.func @transform_1(%arg0: i32) -> (i32, i32) {
    %c0_i32 = arith.constant 0 : i32
    %c0_i32_0 = arith.constant 0 : i32
    %c0_i32_1 = arith.constant 0 : i32
    return %c0_i32, %c0_i32_0 : i32, i32
  }
  func.func @transform_2(%arg0: i32) -> (i32, i32) {
    %c0_i32 = arith.constant 0 : i32
    %c0_i32_0 = arith.constant 0 : i32
    %c0_i32_1 = arith.constant 0 : i32
    return %c0_i32, %c0_i32_0 : i32, i32
  }
  func.func @transform_3(%arg0: i32) -> (i32, i32) {
    %c0_i32 = arith.constant 0 : i32
    %c0_i32_0 = arith.constant 0 : i32
    %c0_i32_1 = arith.constant 0 : i32
    return %c0_i32, %c0_i32_0 : i32, i32
  }
}

</mosaic_0001>

<bundles_post_ra>
// kernel: tpu_custom_call.1
= control target key start
LH: loop header
LB: loop body
LE: loop exit
PB: predicated region body
PF: predicated region fallthrough
CT: control target
= control target key end

     0   :  { %s500_s12 = smov 0   ;;  %s502_s13 = smov 0   ;;  %s641_s0 = inlined_call_operand.vmem [shape: f32[16,256], index: 0, kind: input, shape index: {}]   ;;  %s642_s1 = inlined_call_operand.vmem [shape: f32[32,16], index: 1, kind: input, shape index: {}]   ;;  %s643_s2 = inlined_call_operand.vmem [shape: f32[32,1], index: 2, kind: output, shape index: {0}]   ;;  %s644_s3 = inlined_call_operand.vmem [shape: f32[32,1], index: 3, kind: output, shape index: {1}]  }
   0x1   :  { %s504_s14 = smov 0  }
   0x2 LB: > { %s394_s15 = sadd.s32 4294967295, %s477_s14   ;;  %s517_s16 = sadd.s32 1, %s477_s14   ;;  %s477_s14 = sphi %s504_s14, %s647_s14   ;;  %s473_s13 = sphi %s502_s13, %s646_s13   ;;  %s469_s12 = sphi %s500_s12, %s645_s12  }
   0x3   : > { %s18_s17 = ssub.s32 %s477_s14, %s517_s16  ;;  %s21_s18 = sadd.s32 1, %s473_s13 }
   0x4   : > { %p19_p0 = scmp.eq.s32.totalorder %s18_s17, 0  ;;  %p28_p1 = scmp.ne.s32.totalorder %s473_s13, %s469_s12 }
   0x5   : > { %p29_p2 = scmp.eq.s32.totalorder %s477_s14, 0  ;;  %p396_p4 = scmp.ge.s32.totalorder %s477_s14, 2 }
   0x6   : > { %s526_s19 = scalar_select %p19_p0, %s473_s13, %s21_s18  }
   0x7   : > { %p30_p3 = por %p29_p2, %p28_p1  ;;  %120 = sbr.rel (%p396_p4) target bundleno = 21 (0x15), region = 20 }
   0xe   : > { %123 = sbr.rel (!%p30_p3) target bundleno = 21 (0x15), region = 24  ;;  %s125_s20 = sand.u32 (%p30_p3), 1, %s473_s13  }
   0xf   : > { %s398_s21 = sshll.u32 (%p30_p3), %s477_s14, 3  ;;  %s397_s22 = sshll.u32 (%p30_p3), %s125_s20, 4 }
  0x10   : > { %s129_s25 = scalar_lea.vmem (%p30_p3), %s641_s0, %s398_s21  ;;  %s127_s26 = scalar_lea.vmem (%p30_p3), [#allocation2], %s397_s22 }
  0x11   : > { %v159_v0 = vld [vmem:[%s129_s25] sm:$0xff] (%p30_p3)  ;;  %v161_v1 = vld [vmem:[%s129_s25 + $0x10] sm:$0xff] (%p30_p3) }
  0x12   : > { %160 = vst [vmem:[%s127_s26] sm:$0xff] (%p30_p3), %v159_v0  ;;  %162 = vst [vmem:[%s127_s26 + $0x8] sm:$0xff] (%p30_p3), %v161_v1 }
  0x15 PF: > { %p399_p5 = scmp.ge.s32.totalorder %s477_s14, 1  ;;  %p167_p6 = scmp.lt.s32.totalorder %s477_s14, 3 }
  0x17   : > { %p168_p7 = pnand %p399_p5, %p167_p6 }
  0x18   : > { %s174_s27 = sand.u32 (!%p168_p7), 1, %s469_s12   ;;  %p401_p8 = scmp.ne.s32.totalorder (!%p168_p7), %s394_s15, 0 }
  0x19   : > { %171 = sbr.rel (%p168_p7) target bundleno = 415 (0x19f), region = 62  ;;  %s400_s28 = sshll.u32 (!%p168_p7), %s174_s27, 4 }
  0x1a   : > { %s176_s29 = scalar_lea.vmem (!%p168_p7), [#allocation2], %s400_s28 }
  0x20   : > { %195 = sbr.rel (%p401_p8) target bundleno = 39 (0x27), region = 70  ;;  %vm196_vm0 = vcmask (!%p401_p8), 7168   ;;  %v479_v2 = vmov (!%p401_p8), 0.0  }
  0x21   : > { %197 = vst.msk [vmem:[%s643_s2] sm:$0xff] (!%p401_p8), %vm196_vm0, %v479_v2  ;;  %198 = vst.msk [vmem:[%s643_s2 + $0x8] sm:$0xff] (!%p401_p8), %vm196_vm0, %v479_v2 }
  0x22   : > { %199 = vst.msk [vmem:[%s643_s2 + $0x10] sm:$0xff] (!%p401_p8), %vm196_vm0, %v479_v2  ;;  %200 = vst.msk [vmem:[%s643_s2 + $0x18] sm:$0xff] (!%p401_p8), %vm196_vm0, %v479_v2 }
  0x23   : > { %201 = vst.msk [vmem:[%s644_s3] sm:$0xff] (!%p401_p8), %vm196_vm0, %v479_v2  ;;  %202 = vst.msk [vmem:[%s644_s3 + $0x8] sm:$0xff] (!%p401_p8), %vm196_vm0, %v479_v2 }
  0x24   : > { %203 = vst.msk [vmem:[%s644_s3 + $0x10] sm:$0xff] (!%p401_p8), %vm196_vm0, %v479_v2  ;;  %204 = vst.msk [vmem:[%s644_s3 + $0x18] sm:$0xff] (!%p401_p8), %vm196_vm0, %v479_v2 }
  0x27 PF: > { %v209_v3 = vld [vmem:[%s176_s29] sm:$0xff]  ;;  %v210_v4 = vld [vmem:[%s176_s29 + $0x8] sm:$0xff]  ;;  %vm211_vm1 = vcmask 130048   ;;  %vm325_vm2 = vcmask 7168  }
  0x28   : > { %v205_v5 = vld [vmem:[%s642_s1] sm:$0xff]  ;;  %v424_v6 = vpack.c.bf16 %v210_v4, %v209_v3  ;;  %v207_v7 = vld [vmem:[%s642_s1 + $0x10] sm:$0xff]  ;;  %v206_v8 = vld [vmem:[%s642_s1 + $0x8] sm:$0xff] }
  0x29   : > { %418 = vmatprep.mubr.msk.f32.mxu0 %vm211_vm1, %v205_v5  ;;  %421 = vmatprep.mubr.msk.f32.mxu1 %vm211_vm1, %v207_v7  ;;  %v208_v9 = vld [vmem:[%s642_s1 + $0x18] sm:$0xff]  ;;  %v310_v19 = vld [vmem:[%s643_s2 + $0x8] sm:$0xff]  ;;  %v311_v24 = vld [vmem:[%s643_s2 + $0x10] sm:$0xff] }
  0x2a   : > { %425 = vmatprep.subr.bf16.mxu0 %v424_v6  ;;  %428 = vmatprep.subr.bf16.mxu1 %v424_v6  ;;  %v312_v18 = vld [vmem:[%s643_s2 + $0x18] sm:$0xff]  ;;  %v309_v25 = vld [vmem:[%s643_s2] sm:$0xff]  ;;  %v331_v30 = vld [vmem:[%s644_s3 + $0x8] sm:$0xff] }
  0x2b   : > { %427 = vmatpush3.bf16.msra.mxu0 %v424_v6  ;;  %429 = vmatpush3.bf16.msra.mxu1 %v424_v6  ;;  %v330_v31 = vld [vmem:[%s644_s3] sm:$0xff]  ;;  %v333_v36 = vld [vmem:[%s644_s3 + $0x18] sm:$0xff]  ;;  %v332_v37 = vld [vmem:[%s644_s3 + $0x10] sm:$0xff] }
  0x2e   : > { %419 = vmatmul.mubr.msk.f32.vlgmr.msra.gmra.mrb[0].mxu0 %vm211_vm1, %v206_v8  ;;  %422 = vmatmul.mubr.msk.f32.vlgmr.msra.gmra.mrb[0].mxu1 %vm211_vm1, %v208_v9 }
 0x101   : > { %v420_v10 = vpop.f32.mrb[0].mxu0  ;;  %v423_v11 = vpop.f32.mrb[0].mxu1 }
 0x102   : > { %319 = vadd.xlane.f32.xlu1 %v423_v11  ;;  %v300_v12 = vpop.f32.mrb[1].mxu1  ;;  %315 = vadd.xlane.f32.xlu0 %v420_v10  ;;  %v290_v13 = vpop.f32.mrb[1].mxu0  ;;  %v335_v15 = vmul.f32 %v420_v10, %v420_v10  ;;  %v337_v17 = vmul.f32 %v423_v11, %v423_v11 }
 0x103   : > { %v334_v14 = vmul.f32 %v290_v13, %v290_v13  ;;  %v336_v16 = vmul.f32 %v300_v12, %v300_v12 }
 0x106   : > { %317 = vadd.xlane.f32.xlu1 %v300_v12  ;;  %313 = vadd.xlane.f32.xlu0 %v290_v13 }
 0x10a   : > { %340 = vadd.xlane.f32.xlu1 %v335_v15  ;;  %338 = vadd.xlane.f32.xlu0 %v334_v14 }
 0x10e   : > { %344 = vadd.xlane.f32.xlu1 %v337_v17  ;;  %342 = vadd.xlane.f32.xlu0 %v336_v16 }
 0x18f   : > { %v320_v20 = vpop.xlane.xlu1 %319  ;;  %v316_v21 = vpop.xlane.xlu0 %315 }
 0x190   : > { %v324_v22 = vadd.f32 %v320_v20, %v312_v18  ;;  %v322_v23 = vadd.f32 %v316_v21, %v310_v19 }
 0x192   : > { %329 = vst.msk [vmem:[%s643_s2 + $0x18] sm:$0xff] %vm325_vm2, %v324_v22  ;;  %327 = vst.msk [vmem:[%s643_s2 + $0x8] sm:$0xff] %vm325_vm2, %v322_v23 }
 0x193   : > { %v318_v26 = vpop.xlane.xlu1 %317  ;;  %v314_v27 = vpop.xlane.xlu0 %313 }
 0x194   : > { %v323_v28 = vadd.f32 %v318_v26, %v311_v24  ;;  %v321_v29 = vadd.f32 %v314_v27, %v309_v25 }
 0x196   : > { %328 = vst.msk [vmem:[%s643_s2 + $0x10] sm:$0xff] %vm325_vm2, %v323_v28  ;;  %326 = vst.msk [vmem:[%s643_s2] sm:$0xff] %vm325_vm2, %v321_v29 }
 0x197   : > { %v341_v32 = vpop.xlane.xlu1 %340  ;;  %v339_v33 = vpop.xlane.xlu0 %338 }
 0x198   : > { %v347_v34 = vadd.f32 %v341_v32, %v331_v30  ;;  %v346_v35 = vadd.f32 %v339_v33, %v330_v31 }
 0x19a   : > { %351 = vst.msk [vmem:[%s644_s3 + $0x8] sm:$0xff] %vm325_vm2, %v347_v34  ;;  %350 = vst.msk [vmem:[%s644_s3] sm:$0xff] %vm325_vm2, %v346_v35 }
 0x19b   : > { %v345_v38 = vpop.xlane.xlu1 %344  ;;  %v343_v39 = vpop.xlane.xlu0 %342 }
 0x19c   : > { %v349_v40 = vadd.f32 %v345_v38, %v333_v36  ;;  %v348_v41 = vadd.f32 %v343_v39, %v332_v37 }
 0x19e   : > { %353 = vst.msk [vmem:[%s644_s3 + $0x18] sm:$0xff] %vm325_vm2, %v349_v40  ;;  %352 = vst.msk [vmem:[%s644_s3 + $0x10] sm:$0xff] %vm325_vm2, %v348_v41 }
 0x19f PF: > { %p11_p9 = scmp.ge.s32.totalorder %s517_s16, 4   ;;  %s645_s12 = smov %s473_s13 }
 0x1a0   : > { %s646_s13 = smov %s526_s19  ;;  %s647_s14 = smov %s517_s16 }
 0x1a1   :  { %13 = sbr.rel (!%p11_p9) target bundleno = 2 (0x2), region = 109 }

</bundles_post_ra>
